<compile_context>
chip_gen: v7x
topology: tpu7x:2x2x1
jax: 0.10.0
libtpu: 0.0.40
codegen_flags: <defaults>
</compile_context>

<pallas_src>
import functools

import jax
import jax.numpy as jnp
from jax import lax
from jax.experimental import pallas as pl
from jax.experimental.pallas import tpu as pltpu


def _round_up(a, b):
    return ((a + b - 1) // b) * b


def _dice_sums_kernel(*refs, n_class, true_v, tile, tiles_per_part,
                      has_weight, ragged):
    """Accumulate per-class intersection / cardinality / target counts.

    Refs (in order): x (C, TV), t (1, TV)[, w (1, TV)],
                     inter/card/tsum outputs (C, 1),
                     inter/card/tsum accumulators (C, TV) f32 scratch.
    """
    if has_weight:
        (x_ref, t_ref, w_ref,
         inter_out, card_out, tsum_out,
         inter_acc, card_acc, tsum_acc) = refs
    else:
        (x_ref, t_ref,
         inter_out, card_out, tsum_out,
         inter_acc, card_acc, tsum_acc) = refs
        w_ref = None

    p = pl.program_id(1)
    v_step = pl.program_id(2)

    @pl.when(v_step == 0)
    def _():
        inter_acc[...] = jnp.zeros_like(inter_acc)
        card_acc[...] = jnp.zeros_like(card_acc)
        tsum_acc[...] = jnp.zeros_like(tsum_acc)

    # Unclamped global voxel offset of this tile (used for boundary masking).
    start = (p * tiles_per_part + v_step) * tile
    class_ids = lax.broadcasted_iota(jnp.int32, (n_class, tile), 0)

    def accumulate(masked):
        x = x_ref[...].astype(jnp.float32)          # (C, TV)
        t = t_ref[...].astype(jnp.int32)            # (1, TV)
        if masked:
            lane = lax.broadcasted_iota(jnp.int32, (1, tile), 1)
            valid = (start + lane) < true_v         # (1, TV) bool
            # jnp.where (not mask-multiply) so OOB garbage (possibly NaN)
            # can never leak into the sums.
            x = jnp.where(valid, x, 0.0)
            t = jnp.where(valid, t, -1)             # -1 matches no class
        onehot = (t == class_ids).astype(jnp.float32)   # (C, TV)
        if has_weight:
            w = w_ref[...].astype(jnp.float32)      # (1, TV)
            if masked:
                w = jnp.where(valid, w, 0.0)
            w_nz = (w != 0.0).astype(jnp.float32)
            inter_acc[...] += x * onehot * w
            card_acc[...] += (x + onehot) * w_nz
        else:
            inter_acc[...] += x * onehot
            card_acc[...] += x + onehot
        tsum_acc[...] += onehot

    if ragged:
        # Only boundary tiles pay the masking cost; interior tiles take the
        # unmasked path.
        @pl.when(start + tile <= true_v)
        def _():
            accumulate(False)

        @pl.when(start + tile > true_v)
        def _():
            accumulate(True)
    else:
        accumulate(False)

    # Single cross-lane reduction + tiny output write, once per (n, p).
    @pl.when(v_step == tiles_per_part - 1)
    def _():
        inter_out[...] = jnp.sum(inter_acc[...], axis=1, keepdims=True)
        card_out[...] = jnp.sum(card_acc[...], axis=1, keepdims=True)
        tsum_out[...] = jnp.sum(tsum_acc[...], axis=1, keepdims=True)


def _dice_sums(x_ncv, t_n1v, w_n1v, *, tile, parallel_splits):
    """Run the Pallas reduction kernel; returns (inter, card, tsum), each (C,)."""
    N, C, V = x_ncv.shape
    has_weight = w_n1v is not None

    # --- tile sizing: largest tile within a ~12 MiB VMEM budget -------------
    x_b = jnp.dtype(x_ncv.dtype).itemsize
    t_b = jnp.dtype(t_n1v.dtype).itemsize
    w_b = jnp.dtype(w_n1v.dtype).itemsize if has_weight else 0
    # 2x double-buffered inputs + 3 f32 accumulators, per lane of the tile.
    per_lane = 2 * C * x_b + 3 * C * 4 + 2 * t_b + 2 * w_b
    budget = 12 * 1024 * 1024
    cap = max(128, (budget // per_lane) // 128 * 128)

    tv = min(int(tile), _round_up(V, 128), cap)
    tv = max(128, (tv // 128) * 128)

    nb = (V + tv - 1) // tv                     # number of voxel tiles
    P = max(1, min(int(parallel_splits), nb))   # parallel voxel split (v7x)
    T = (nb + P - 1) // P                       # tiles per split
    ragged = (P * T * tv != V)                  # any partial / OOB tiles?

    kernel = functools.partial(
        _dice_sums_kernel, n_class=C, true_v=V, tile=tv, tiles_per_part=T,
        has_weight=has_weight, ragged=ragged)

    def vox_block(p, v):
        # Clamp so the pipeline never addresses a nonexistent block; the
        # kernel's positional mask zeroes any re-read data.
        return jnp.minimum(p * T + v, nb - 1)

    in_specs = [
        pl.BlockSpec((None, C, tv), lambda n, p, v: (n, 0, vox_block(p, v))),
        pl.BlockSpec((None, 1, tv), lambda n, p, v: (n, 0, vox_block(p, v))),
    ]
    operands = [x_ncv, t_n1v]
    if has_weight:
        in_specs.append(
            pl.BlockSpec((None, 1, tv), lambda n, p, v: (n, 0, vox_block(p, v))))
        operands.append(w_n1v)

    out_spec = pl.BlockSpec((None, None, C, 1), lambda n, p, v: (n, p, 0, 0))
    out_shape = [
        jax.ShapeDtypeStruct((N, P, C, 1), jnp.float32),
        jax.ShapeDtypeStruct((N, P, C, 1), jnp.float32),
        jax.ShapeDtypeStruct((N, P, C, 1), jnp.float32),
    ]

    inter, card, tsum = pl.pallas_call(
        kernel,
        out_shape=out_shape,
        grid_spec=pltpu.PrefetchScalarGridSpec(
            num_scalar_prefetch=0,
            grid=(N, P, T),
            in_specs=in_specs,
            out_specs=[out_spec, out_spec, out_spec],
            scratch_shapes=[
                pltpu.VMEM((C, tv), jnp.float32),
                pltpu.VMEM((C, tv), jnp.float32),
                pltpu.VMEM((C, tv), jnp.float32),
            ],
        ),
        compiler_params=pltpu.CompilerParams(
            dimension_semantics=("parallel", "parallel", "arbitrary")),
    )(*operands)

    inter = inter.sum(axis=(0, 1))[:, 0]
    card = card.sum(axis=(0, 1))[:, 0]
    tsum = tsum.sum(axis=(0, 1))[:, 0]
    return inter, card, tsum


@functools.partial(
    jax.jit, static_argnames=("smooth", "mode", "tile", "parallel_splits"))
def softmax_dice_loss(inputs, target, weight=None, *, smooth=1e-6,
                      mode="binary", tile=16384, parallel_splits=2):
    """Pallas implementation of SoftmaxDiceLoss.forward.

    inputs : (N, C, *spatial) softmax output
    target : (N, *spatial) integer label mask  (or (N, 1, *spatial))
    weight : optional (N, *spatial) or (N, 1, *spatial) voxel weights
    """
    if abs(smooth) <= 0:
        raise ValueError("Smoothing factor needs to be non-zero")
    if mode not in ("binary", "average", "average_present_classes"):
        raise ValueError(f'Unknown mode "{mode}"')
    if target.shape == inputs.shape:
        # TODO(synk): dense one-hot targets (target.shape == input.shape) are
        # not wired up; only the integer-label path (the common case) is
        # implemented.
        raise NotImplementedError(
            "Dense one-hot targets are not supported by the Pallas kernel")

    N, C = inputs.shape[0], inputs.shape[1]
    ndim = inputs.ndim

    # Free reshapes only -- no transpose, no pad, no full-tensor copies.
    x_ncv = inputs.reshape(N, C, -1)
    V = x_ncv.shape[2]

    tgt = target
    if not jnp.issubdtype(tgt.dtype, jnp.integer):
        tgt = tgt.astype(jnp.int32)
    t_n1v = tgt.reshape(N, 1, V)        # handles both (N,*S) and (N,1,*S)

    if weight is None:
        w_n1v = None                    # static specialization: no weight stream
    else:
        w_n1v = weight.reshape(N, 1, V)  # native dtype streamed as-is

    inter, card, tsum = _dice_sums(
        x_ncv, t_n1v, w_n1v, tile=tile, parallel_splits=parallel_splits)

    if mode == "binary":
        dice = (2.0 * inter.sum() + smooth) / (card.sum() + smooth)
        return (1.0 - dice).astype(inputs.dtype)

    dice = (2.0 * inter + smooth) / (card + smooth)
    if mode == "average":
        return (1.0 - dice.mean()).astype(inputs.dtype)

    # average_present_classes
    n_present = jnp.sum(tsum > 0).astype(dice.dtype)
    return (1.0 - dice.sum() / n_present).astype(inputs.dtype)


def _reference(inputs, target, weight=None, *, smooth=1e-6, mode="binary"):
    """Pure-JAX reference mirroring the PyTorch forward (integer targets)."""
    n_classes = inputs.shape[1]
    ndim = inputs.ndim
    tgt = target
    if tgt.ndim == ndim:
        tgt = jnp.squeeze(tgt, axis=1)
    onehot = jax.nn.one_hot(tgt.astype(jnp.int32), n_classes,
                            dtype=inputs.dtype)             # (N, *S, C)
    perm = (0, ndim - 1) + tuple(range(1, ndim - 1))
    onehot = jnp.transpose(onehot, perm)                    # (N, C, *S)
    if weight is None:
        w = jnp.ones_like(inputs[:, :1])
    else:
        w = weight if weight.ndim == ndim else weight[:, None]
    dims = tuple(range(ndim)) if mode == "binary" else (0,) + tuple(range(2, ndim))
    inter = jnp.sum(inputs * onehot * w, axis=dims)
    card = jnp.sum((inputs + onehot) * (w != 0), axis=dims)
    dice = (2 * inter + smooth) / (card + smooth)
    if mode == "binary":
        return 1 - dice
    if mode == "average":
        return 1 - dice.mean()
    n_present = jnp.sum(jnp.sum(onehot, axis=dims) > 0).astype(dice.dtype)
    return 1 - dice.sum() / n_present


if __name__ == "__main__":
    key = jax.random.PRNGKey(0)

    def make_case(k, shape_ncs):
        N, C = shape_ncs[0], shape_ncs[1]
        k1, k2, k3 = jax.random.split(k, 3)
        logits = jax.random.normal(k1, shape_ncs, dtype=jnp.float32)
        inputs = jax.nn.softmax(logits, axis=1)
        target = jax.random.randint(k2, (N,) + shape_ncs[2:], 0, C).astype(jnp.int32)
        weight = (jax.random.uniform(k3, (N,) + shape_ncs[2:]) > 0.2).astype(jnp.float32)
        return inputs, target, weight

    cases = [
        ((2, 4, 8, 8, 8), dict()),                               # aligned, 1 tile
        ((1, 3, 7, 9, 5), dict()),                               # ragged last tile
        ((2, 5, 4, 10, 41), dict(tile=256, parallel_splits=2)),  # multi-tile + split
    ]
    keys = jax.random.split(key, len(cases))
    for (shape, kw), k in zip(cases, keys):
        inputs, target, weight = make_case(k, shape)
        for mode in ("binary", "average", "average_present_classes"):
            out = jax.block_until_ready(softmax_dice_loss(
                inputs, target, weight, smooth=1e-6, mode=mode, **kw))
            ref = _reference(inputs, target, weight, smooth=1e-6, mode=mode)
            assert jnp.allclose(out, ref, atol=1e-5, rtol=1e-5), (shape, mode, out, ref)
        # weight=None specialization (no weight stream compiled in).
        out = jax.block_until_ready(softmax_dice_loss(
            inputs, target, None, smooth=1e-6, mode="average", **kw))
        ref = _reference(inputs, target, None, smooth=1e-6, mode="average")
        assert jnp.allclose(out, ref, atol=1e-5, rtol=1e-5), (shape, "no-weight", out, ref)

    print("KERNEL_OK")
</pallas_src>

<mosaic_0001>
module attributes {stable_mosaic.version = 11 : i64} {
  func.func @_dice_sums_kernel(%arg0: i32, %arg1: i32, %arg2: i32, %arg3: memref<1x4x512xf32, #tpu.memory_space<vmem>>, %arg4: memref<1x1x512xi32, #tpu.memory_space<vmem>>, %arg5: memref<1x1x512xf32, #tpu.memory_space<vmem>>, %arg6: memref<1x1x4x1xf32, #tpu.memory_space<vmem>>, %arg7: memref<1x1x4x1xf32, #tpu.memory_space<vmem>>, %arg8: memref<1x1x4x1xf32, #tpu.memory_space<vmem>>, %arg9: memref<4x512xf32, #tpu.memory_space<vmem>>, %arg10: memref<4x512xf32, #tpu.memory_space<vmem>>, %arg11: memref<4x512xf32, #tpu.memory_space<vmem>>) attributes {dimension_semantics = [#tpu.dimension_semantics<parallel>, #tpu.dimension_semantics<parallel>, #tpu.dimension_semantics<arbitrary>], iteration_bounds = array<i64: 2, 1, 1>, scalar_prefetch = 0 : i64, scratch_operands = 3 : i64, tpu.core_type = #tpu.core_type<tc>, window_params = [{transform_indices = @transform_0, window_bounds = array<i64: 1, 4, 512>}, {transform_indices = @transform_1, window_bounds = array<i64: 1, 1, 512>}, {transform_indices = @transform_2, window_bounds = array<i64: 1, 1, 512>}, {transform_indices = @transform_3, window_bounds = array<i64: 1, 1, 4, 1>}, {transform_indices = @transform_4, window_bounds = array<i64: 1, 1, 4, 1>}, {transform_indices = @transform_5, window_bounds = array<i64: 1, 1, 4, 1>}]} {
    %c0_i32 = arith.constant 0 : i32
    %0 = arith.cmpi eq, %arg2, %c0_i32 : i32
    %1 = arith.extui %0 : i1 to i32
    %c0_i32_0 = arith.constant 0 : i32
    %2 = arith.cmpi ne, %1, %c0_i32_0 : i32
    scf.if %2 {
      %cst_23 = arith.constant 0.000000e+00 : f32
      %36 = vector.broadcast %cst_23 : f32 to vector<4x512xf32>
      %c0_24 = arith.constant 0 : index
      %c0_25 = arith.constant 0 : index
      %37 = vector.load %arg9[%c0_24, %c0_25] : memref<4x512xf32, #tpu.memory_space<vmem>>, vector<4x512xf32>
      tpu.vector_store %arg9[%c0_24, %c0_25], %36 {strides = array<i32>} : memref<4x512xf32, #tpu.memory_space<vmem>>, vector<4x512xf32>,
      %cst_26 = arith.constant 0.000000e+00 : f32
      %38 = vector.broadcast %cst_26 : f32 to vector<4x512xf32>
      %c0_27 = arith.constant 0 : index
      %c0_28 = arith.constant 0 : index
      %39 = vector.load %arg10[%c0_27, %c0_28] : memref<4x512xf32, #tpu.memory_space<vmem>>, vector<4x512xf32>
      tpu.vector_store %arg10[%c0_27, %c0_28], %38 {strides = array<i32>} : memref<4x512xf32, #tpu.memory_space<vmem>>, vector<4x512xf32>,
      %cst_29 = arith.constant 0.000000e+00 : f32
      %40 = vector.broadcast %cst_29 : f32 to vector<4x512xf32>
      %c0_30 = arith.constant 0 : index
      %c0_31 = arith.constant 0 : index
      %41 = vector.load %arg11[%c0_30, %c0_31] : memref<4x512xf32, #tpu.memory_space<vmem>>, vector<4x512xf32>
      tpu.vector_store %arg11[%c0_30, %c0_31], %40 {strides = array<i32>} : memref<4x512xf32, #tpu.memory_space<vmem>>, vector<4x512xf32>,
    } else {
    }
    %3 = tpu.iota {dimensions = array<i32: 0>} : vector<4x512xi32>
    %c0 = arith.constant 0 : index
    %c0_1 = arith.constant 0 : index
    %c0_2 = arith.constant 0 : index
    %4 = vector.load %arg3[%c0, %c0_1, %c0_2] : memref<1x4x512xf32, #tpu.memory_space<vmem>>, vector<1x4x512xf32>
    %5 = vector.shape_cast %4 : vector<1x4x512xf32> to vector<4x512xf32>
    %c0_3 = arith.constant 0 : index
    %c0_4 = arith.constant 0 : index
    %c0_5 = arith.constant 0 : index
    %6 = vector.load %arg4[%c0_3, %c0_4, %c0_5] : memref<1x1x512xi32, #tpu.memory_space<vmem>>, vector<1x1x512xi32>
    %7 = vector.shape_cast %6 : vector<1x1x512xi32> to vector<1x512xi32>
    %8 = vector.broadcast %7 : vector<1x512xi32> to vector<4x512xi32>
    %9 = arith.cmpi eq, %8, %3 : vector<4x512xi32>
    %10 = arith.extui %9 : vector<4x512xi1> to vector<4x512xi32>
    %11 = arith.sitofp %10 : vector<4x512xi32> to vector<4x512xf32>
    %c0_6 = arith.constant 0 : index
    %c0_7 = arith.constant 0 : index
    %c0_8 = arith.constant 0 : index
    %12 = vector.load %arg5[%c0_6, %c0_7, %c0_8] : memref<1x1x512xf32, #tpu.memory_space<vmem>>, vector<1x1x512xf32>
    %13 = vector.shape_cast %12 : vector<1x1x512xf32> to vector<1x512xf32>
    %cst = arith.constant 0.000000e+00 : f32
    %14 = vector.broadcast %cst : f32 to vector<1x512xf32>
    %15 = arith.cmpf one, %13, %14 : vector<1x512xf32>
    %16 = arith.extui %15 : vector<1x512xi1> to vector<1x512xi32>
    %17 = arith.sitofp %16 : vector<1x512xi32> to vector<1x512xf32>
    %c0_9 = arith.constant 0 : index
    %c0_10 = arith.constant 0 : index
    %18 = vector.load %arg9[%c0_9, %c0_10] : memref<4x512xf32, #tpu.memory_space<vmem>>, vector<4x512xf32>
    %19 = arith.mulf %5, %11 : vector<4x512xf32>
    %20 = vector.broadcast %13 : vector<1x512xf32> to vector<4x512xf32>
    %21 = arith.mulf %19, %20 : vector<4x512xf32>
    %22 = arith.addf %18, %21 : vector<4x512xf32>
    %c0_11 = arith.constant 0 : index
    %c0_12 = arith.constant 0 : index
    %23 = vector.load %arg9[%c0_11, %c0_12] : memref<4x512xf32, #tpu.memory_space<vmem>>, vector<4x512xf32>
    tpu.vector_store %arg9[%c0_11, %c0_12], %22 {strides = array<i32>} : memref<4x512xf32, #tpu.memory_space<vmem>>, vector<4x512xf32>,
    %c0_13 = arith.constant 0 : index
    %c0_14 = arith.constant 0 : index
    %24 = vector.load %arg10[%c0_13, %c0_14] : memref<4x512xf32, #tpu.memory_space<vmem>>, vector<4x512xf32>
    %25 = arith.addf %5, %11 : vector<4x512xf32>
    %26 = vector.broadcast %17 : vector<1x512xf32> to vector<4x512xf32>
    %27 = arith.mulf %25, %26 : vector<4x512xf32>
    %28 = arith.addf %24, %27 : vector<4x512xf32>
    %c0_15 = arith.constant 0 : index
    %c0_16 = arith.constant 0 : index
    %29 = vector.load %arg10[%c0_15, %c0_16] : memref<4x512xf32, #tpu.memory_space<vmem>>, vector<4x512xf32>
    tpu.vector_store %arg10[%c0_15, %c0_16], %28 {strides = array<i32>} : memref<4x512xf32, #tpu.memory_space<vmem>>, vector<4x512xf32>,
    %c0_17 = arith.constant 0 : index
    %c0_18 = arith.constant 0 : index
    %30 = vector.load %arg11[%c0_17, %c0_18] : memref<4x512xf32, #tpu.memory_space<vmem>>, vector<4x512xf32>
    %31 = arith.addf %30, %11 : vector<4x512xf32>
    %c0_19 = arith.constant 0 : index
    %c0_20 = arith.constant 0 : index
    %32 = vector.load %arg11[%c0_19, %c0_20] : memref<4x512xf32, #tpu.memory_space<vmem>>, vector<4x512xf32>
    tpu.vector_store %arg11[%c0_19, %c0_20], %31 {strides = array<i32>} : memref<4x512xf32, #tpu.memory_space<vmem>>, vector<4x512xf32>,
    %c0_i32_21 = arith.constant 0 : i32
    %33 = arith.cmpi eq, %arg2, %c0_i32_21 : i32
    %34 = arith.extui %33 : i1 to i32
    %c0_i32_22 = arith.constant 0 : i32
    %35 = arith.cmpi ne, %34, %c0_i32_22 : i32
    scf.if %35 {
      %c0_23 = arith.constant 0 : index
      %c0_24 = arith.constant 0 : index
      %36 = vector.load %arg9[%c0_23, %c0_24] : memref<4x512xf32, #tpu.memory_space<vmem>>, vector<4x512xf32>
      %cst_25 = arith.constant dense<0.000000e+00> : vector<4xf32>
      %37 = vector.multi_reduction <add>, %36, %cst_25 [1] : vector<4x512xf32> to vector<4xf32>
      %38 = vector.shape_cast %37 : vector<4xf32> to vector<4x1xf32>
      %c0_26 = arith.constant 0 : index
      %c0_27 = arith.constant 0 : index
      %c0_28 = arith.constant 0 : index
      %c0_29 = arith.constant 0 : index
      %39 = vector.load %arg6[%c0_26, %c0_27, %c0_28, %c0_29] : memref<1x1x4x1xf32, #tpu.memory_space<vmem>>, vector<1x1x4x1xf32>
      %40 = vector.shape_cast %39 : vector<1x1x4x1xf32> to vector<4x1xf32>
      %41 = vector.shape_cast %38 : vector<4x1xf32> to vector<1x1x4x1xf32>
      tpu.vector_store %arg6[%c0_26, %c0_27, %c0_28, %c0_29], %41 {strides = array<i32>} : memref<1x1x4x1xf32, #tpu.memory_space<vmem>>, vector<1x1x4x1xf32>,
      %c0_30 = arith.constant 0 : index
      %c0_31 = arith.constant 0 : index
      %42 = vector.load %arg10[%c0_30, %c0_31] : memref<4x512xf32, #tpu.memory_space<vmem>>, vector<4x512xf32>
      %cst_32 = arith.constant dense<0.000000e+00> : vector<4xf32>
      %43 = vector.multi_reduction <add>, %42, %cst_32 [1] : vector<4x512xf32> to vector<4xf32>
      %44 = vector.shape_cast %43 : vector<4xf32> to vector<4x1xf32>
      %c0_33 = arith.constant 0 : index
      %c0_34 = arith.constant 0 : index
      %c0_35 = arith.constant 0 : index
      %c0_36 = arith.constant 0 : index
      %45 = vector.load %arg7[%c0_33, %c0_34, %c0_35, %c0_36] : memref<1x1x4x1xf32, #tpu.memory_space<vmem>>, vector<1x1x4x1xf32>
      %46 = vector.shape_cast %45 : vector<1x1x4x1xf32> to vector<4x1xf32>
      %47 = vector.shape_cast %44 : vector<4x1xf32> to vector<1x1x4x1xf32>
      tpu.vector_store %arg7[%c0_33, %c0_34, %c0_35, %c0_36], %47 {strides = array<i32>} : memref<1x1x4x1xf32, #tpu.memory_space<vmem>>, vector<1x1x4x1xf32>,
      %c0_37 = arith.constant 0 : index
      %c0_38 = arith.constant 0 : index
      %48 = vector.load %arg11[%c0_37, %c0_38] : memref<4x512xf32, #tpu.memory_space<vmem>>, vector<4x512xf32>
      %cst_39 = arith.constant dense<0.000000e+00> : vector<4xf32>
      %49 = vector.multi_reduction <add>, %48, %cst_39 [1] : vector<4x512xf32> to vector<4xf32>
      %50 = vector.shape_cast %49 : vector<4xf32> to vector<4x1xf32>
      %c0_40 = arith.constant 0 : index
      %c0_41 = arith.constant 0 : index
      %c0_42 = arith.constant 0 : index
      %c0_43 = arith.constant 0 : index
      %51 = vector.load %arg8[%c0_40, %c0_41, %c0_42, %c0_43] : memref<1x1x4x1xf32, #tpu.memory_space<vmem>>, vector<1x1x4x1xf32>
      %52 = vector.shape_cast %51 : vector<1x1x4x1xf32> to vector<4x1xf32>
      %53 = vector.shape_cast %50 : vector<4x1xf32> to vector<1x1x4x1xf32>
      tpu.vector_store %arg8[%c0_40, %c0_41, %c0_42, %c0_43], %53 {strides = array<i32>} : memref<1x1x4x1xf32, #tpu.memory_space<vmem>>, vector<1x1x4x1xf32>,
    } else {
    }
    return
  }
  func.func @transform_0(%arg0: i32, %arg1: i32, %arg2: i32) -> (i32, i32, i32) {
    %c1_i32 = arith.constant 1 : i32
    %0 = arith.muli %arg1, %c1_i32 : i32
    %1 = arith.addi %0, %arg2 : i32
    %c0_i32 = arith.constant 0 : i32
    %2 = arith.minsi %1, %c0_i32 : i32
    %c0_i32_0 = arith.constant 0 : i32
    %c0_i32_1 = arith.constant 0 : i32
    return %arg0, %c0_i32_0, %2 : i32, i32, i32
  }
  func.func @transform_1(%arg0: i32, %arg1: i32, %arg2: i32) -> (i32, i32, i32) {
    %c1_i32 = arith.constant 1 : i32
    %0 = arith.muli %arg1, %c1_i32 : i32
    %1 = arith.addi %0, %arg2 : i32
    %c0_i32 = arith.constant 0 : i32
    %2 = arith.minsi %1, %c0_i32 : i32
    %c0_i32_0 = arith.constant 0 : i32
    %c0_i32_1 = arith.constant 0 : i32
    return %arg0, %c0_i32_0, %2 : i32, i32, i32
  }
  func.func @transform_2(%arg0: i32, %arg1: i32, %arg2: i32) -> (i32, i32, i32) {
    %c1_i32 = arith.constant 1 : i32
    %0 = arith.muli %arg1, %c1_i32 : i32
    %1 = arith.addi %0, %arg2 : i32
    %c0_i32 = arith.constant 0 : i32
    %2 = arith.minsi %1, %c0_i32 : i32
    %c0_i32_0 = arith.constant 0 : i32
    %c0_i32_1 = arith.constant 0 : i32
    return %arg0, %c0_i32_0, %2 : i32, i32, i32
  }
  func.func @transform_3(%arg0: i32, %arg1: i32, %arg2: i32) -> (i32, i32, i32, i32) {
    %c0_i32 = arith.constant 0 : i32
    %c0_i32_0 = arith.constant 0 : i32
    %c0_i32_1 = arith.constant 0 : i32
    return %arg0, %arg1, %c0_i32, %c0_i32_0 : i32, i32, i32, i32
  }
  func.func @transform_4(%arg0: i32, %arg1: i32, %arg2: i32) -> (i32, i32, i32, i32) {
    %c0_i32 = arith.constant 0 : i32
    %c0_i32_0 = arith.constant 0 : i32
    %c0_i32_1 = arith.constant 0 : i32
    return %arg0, %arg1, %c0_i32, %c0_i32_0 : i32, i32, i32, i32
  }
  func.func @transform_5(%arg0: i32, %arg1: i32, %arg2: i32) -> (i32, i32, i32, i32) {
    %c0_i32 = arith.constant 0 : i32
    %c0_i32_0 = arith.constant 0 : i32
    %c0_i32_1 = arith.constant 0 : i32
    return %arg0, %arg1, %c0_i32, %c0_i32_0 : i32, i32, i32, i32
  }
}

</mosaic_0001>

<bundles_post_ra>
// kernel: softmax_dice_loss.1
= control target key start
LH: loop header
LB: loop body
LE: loop exit
PB: predicated region body
PF: predicated region fallthrough
CT: control target
= control target key end

     0   :  { %11 = vsyncpa [#allocation6], 0  ;;  %s1150_s0 = inlined_call_operand.vmem [shape: f32[2,4,512], index: 0, kind: input, shape index: {}]   ;;  %s1151_s1 = inlined_call_operand.vmem [shape: s32[2,1,512], index: 1, kind: input, shape index: {}]   ;;  %s1152_s2 = inlined_call_operand.vmem [shape: f32[2,1,512], index: 2, kind: input, shape index: {}]   ;;  %s1153_s3 = inlined_call_operand.vmem [shape: f32[2,1,4,1], index: 3, kind: output, shape index: {0}]   ;;  %s1154_s4 = inlined_call_operand.vmem [shape: f32[2,1,4,1], index: 4, kind: output, shape index: {1}]   ;;  %s1155_s5 = inlined_call_operand.hbm [shape: f32[2,1,4,1], index: 5, kind: output, shape index: {2}]  }
   0x1   :  { %13 = vsyncpa [#allocation6 + $0x1], 0  ;;  %s1004_s18 = smov 0   ;;  %s1006_s19 = smov 0  }
   0x2   :  { %s1008_s20 = smov 0   ;;  %s1010_s21 = smov 0  }
   0x3   :  { %s1012_s22 = smov 0   ;;  %s1014_s23 = smov 0  }
   0x4 LB: > { %s812_s24 = sadd.s32 4294967295, %s970_s23   ;;  %s813_s25 = sadd.s32 4294967294, %s970_s23   ;;  %s970_s23 = sphi %s1014_s23, %s19_s23   ;;  %s966_s22 = sphi %s1012_s22, %s1162_s22   ;;  %s962_s21 = sphi %s1010_s21, %s1161_s21   ;;  %s958_s20 = sphi %s1008_s20, %s1160_s20   ;;  %s954_s19 = sphi %s1006_s19, %s1159_s19   ;;  %s950_s18 = sphi %s1004_s18, %s1158_s18  }
   0x5   : > { %s38_s26 = sadd.s32 1, %s966_s22  ;;  %s205_s27 = sadd.s32 1, %s958_s20 }
   0x6   : > { %p40_p0 = scmp.ge.s32.totalorder %s38_s26, 2  ;;  %p215_p1 = scmp.ne.s32.totalorder %s958_s20, %s954_s19 }
   0x7   : > { %p216_p2 = scmp.eq.s32.totalorder %s812_s24, 1  ;;  %p221_p3 = scmp.ne.s32.totalorder %s954_s19, %s950_s18 }
   0x8   : > { %s1164_s26 = smov (%p40_p0, %s38_s26), 0  ;;  %p222_p5 = scmp.eq.s32.totalorder %s813_s25, 1 }
   0x9   : > { %p1044_p4 = por %p216_p2, %p215_p1  ;;  %s200_s29 = ssub.s32 %s966_s22, %s1164_s26 }
   0xa   : > { %p816_p6 = scmp.ge.s32.totalorder %s970_s23, 1  ;;  %p203_p7 = scmp.eq.s32.totalorder %s200_s29, 0 }
   0xb   : > { %p1051_p8 = por %p222_p5, %p221_p3  ;;  %p295_p9 = scmp.lt.s32.totalorder %s970_s23, 3 }
   0xc   : > { %s1057_s6 = scalar_select %p203_p7, %s958_s20, %s205_s27  }
   0xd   : > { %p296_p10 = pnand %p816_p6, %p295_p9 }
   0xe   : > { %p370_p11 = scmp.lt.s32.totalorder (!%p296_p10), %s962_s21, 1  ;;  %v436_v0 = vlaneseq (!%p296_p10)  ;;  %vm560_vm0 = vcmask (!%p296_p10), 1043456   ;;  %v972_v14 = vmov (!%p296_p10), 0.0   ;;  %s363_s25 = sand.u32 (!%p296_p10), 1, %s954_s19   ;;  %vm570_vm6 = vcmask (!%p296_p10), 3072  }
   0xf   : > { %299 = sbr.rel (%p296_p10) target bundleno = 198 (0xc6), region = 32  ;;  %s817_s27 = sshll.u32 (!%p296_p10), %s363_s25, 2 }
  0x10   : > { %v437_v1 = vshrl.u32 (!%p296_p10), %v436_v0, 7  ;;  %s830_s29 = sshll.u32 (!%p296_p10), %s962_s21, 6  ;;  %s623_s13 = scalar_lea.sflag (!%p296_p10), [#allocation6], %s363_s25 }
  0x12   : > { %v443_v2 = vsub.s32 (!%p296_p10), 0, %v437_v1  ;;  %v447_v3 = vsub.s32 (!%p296_p10), 1, %v437_v1  ;;  %v451_v4 = vsub.s32 (!%p296_p10), 2, %v437_v1  ;;  %v455_v5 = vsub.s32 (!%p296_p10), 3, %v437_v1 }
  0x16   : > { %s371_s7 = scalar_select %p370_p11, %s962_s21, 1 }
  0x17   : > { %s973_s21 = smov [#allocation5]  }
  0x18   : > { %s1061_s8 = sshll.u32 %s371_s7, 2  ;;  %s833_s9 = sshll.u32 %s371_s7, 4 }
  0x19   : > { %s392_s12 = scalar_lea.vmem %s1151_s1, %s1061_s8  ;;  %s407_s15 = scalar_lea.vmem %s1152_s2, %s1061_s8 }
  0x1a   : > { %v440_v6 = vld [vmem:[%s392_s12] sm:$0xf]  ;;  %s377_s24 = scalar_lea.vmem %s1150_s0, %s833_s9  ;;  %s365_s7 = scalar_lea.vmem [#allocation5], %s817_s27 }
  0x1b   : > { %v469_v7 = vld [vmem:[%s407_s15] sm:$0xf]  ;;  %v444_v8 = vrot.slane %v440_v6, %v443_v2  ;;  %v448_v9 = vrot.slane %v440_v6, %v447_v3  ;;  %v452_v10 = vrot.slane %v440_v6, %v451_v4  ;;  %v456_v11 = vrot.slane %v440_v6, %v455_v5  ;;  %v439_v24 = vld [vmem:[%s377_s24 + $0x8] sm:$0xff]  ;;  %s643_s9 = sshll.u32 %s365_s7, 4  ;;  %s1092_s12 = scalar_lea.hbm %s1155_s5, %s830_s29  ;;  %s1094_s9 = int_to_ptr.vmem [resolvable:$true] %s643_s9 }
  0x1c   : > { %vm470_vm1 = vcmp.ne.f32.partialorder %v469_v7, 0.0  ;;  %v489_v12 = vrot.slane %v469_v7, %v443_v2  ;;  %v493_v13 = vrot.slane %v469_v7, %v447_v3  ;;  %v438_v23 = vld [vmem:[%s377_s24] sm:$0xff]  ;;  %v497_v26 = vrot.slane %v469_v7, %v451_v4  ;;  %s892_s14 = scalar_lea.vmem %s1094_s9, 64  ;;  %s896_s15 = sshll.u32 %s973_s21, 4  ;;  %s897_s15 = int_to_ptr.vmem [resolvable:$false] %s896_s15 }
  0x1d   : > { %vm457_vm2 = vcmp.eq.s32.totalorder %v444_v8, %v437_v1  ;;  %vm458_vm3 = vcmp.eq.s32.totalorder %v448_v9, %v437_v1  ;;  %vm459_vm4 = vcmp.eq.s32.totalorder %v452_v10, %v437_v1  ;;  %vm460_vm5 = vcmp.eq.s32.totalorder %v456_v11, %v437_v1  ;;  %p893_p12 = scmp.ne.s32.totalorder %s1094_s9, %s892_s14  ;;  %s898_s16 = scalar_lea.vmem %s897_s15, 128 }
  0x1e   : > { %v824_v15 = vsel %vm457_vm2, 1.0, %v972_v14  ;;  %v825_v16 = vsel %vm458_vm3, 1.0, %v972_v14  ;;  %v826_v17 = vsel %vm459_vm4, 1.0, %v972_v14  ;;  %v827_v18 = vsel %vm460_vm5, 1.0, %v972_v14  ;;  %p899_p1 = scmp.lt.s32.totalorder %s1094_s9, %s897_s15  ;;  %p900_p2 = scmp.lt.s32.totalorder %s898_s16, %s892_s14 }
  0x1f   : > { %v479_v19 = vcombine.low %v824_v15, %v825_v16  ;;  %v480_v20 = vcombine.low %v826_v17, %v827_v18  ;;  %v834_v21 = vcombine.low %v825_v16, %v825_v16  ;;  %v835_v22 = vcombine.low %v827_v18, %v827_v18  ;;  %p894_p13 = pnand %p893_p12, %p1044_p4 }
  0x20   : > { %v828_v25 = vsel %vm470_vm1, 1.0, %v972_v14  ;;  %v501_v27 = vrot.slane %v469_v7, %v455_v5  ;;  %v502_v28 = vcombine.low %v489_v12, %v493_v13  ;;  %p901_p3 = por %p900_p2, %p899_p1 }
  0x21   : > { %v598_v29 = vsel %vm560_vm0, %v479_v19, 0.0  ;;  %v599_v30 = vsel %vm560_vm0, %v834_v21, 0.0  ;;  %v601_v31 = vsel %vm560_vm0, %v480_v20, 0.0  ;;  %v603_v32 = vsel %vm560_vm0, %v835_v22, 0.0  ;;  %p895_p0 = pneg %p894_p13 }
  0x22   : > { %v600_v33 = vadd.f32 %v599_v30, %v598_v29  ;;  %v514_v34 = vadd.f32 %v479_v19, %v438_v23  ;;  %v515_v35 = vadd.f32 %v480_v20, %v439_v24  ;;  %v520_v36 = vrot.slane %v828_v25, %v443_v2 }
  0x23   : > { %v524_v37 = vrot.slane %v828_v25, %v447_v3  ;;  %v528_v38 = vrot.slane %v828_v25, %v451_v4  ;;  %v532_v39 = vrot.slane %v828_v25, %v455_v5  ;;  %v483_v40 = vmul.f32 %v479_v19, %v438_v23  ;;  %p902_p5 = pnand %p901_p3, %p895_p0 }
  0x24   : > { %v602_v41 = vadd.f32 %v601_v31, %v600_v33  ;;  %v484_v42 = vmul.f32 %v480_v20, %v439_v24  ;;  %v503_v43 = vcombine.low %v497_v26, %v501_v27 }
  0x25   : > { %v533_v44 = vcombine.low %v520_v36, %v524_v37  ;;  %v534_v45 = vcombine.low %v528_v38, %v532_v39  ;;  %v506_v46 = vmul.f32 %v502_v28, %v483_v40 }
  0x26   : > { %v604_v47 = vadd.f32 %v603_v32, %v602_v41  ;;  %v507_v48 = vmul.f32 %v503_v43, %v484_v42 }
  0x27   : > { %v537_v49 = vmul.f32 %v533_v44, %v514_v34  ;;  %v538_v50 = vmul.f32 %v534_v45, %v515_v35  ;;  %v556_v51 = vcombine.high %v506_v46, %v506_v46  ;;  %v561_v53 = vsel %vm560_vm0, %v506_v46, 0.0 }
  0x28   : > { %605 = vadd.xlane.f32.xlu0 %v604_v47  ;;  %v557_v52 = vcombine.high %v507_v48, %v507_v48  ;;  %v564_v58 = vsel %vm560_vm0, %v507_v48, 0.0 }
  0x29   : > { %v576_v54 = vcombine.high %v537_v49, %v537_v49  ;;  %v577_v55 = vcombine.high %v538_v50, %v538_v50  ;;  %v580_v56 = vsel %vm560_vm0, %v537_v49, 0.0  ;;  %v562_v57 = vsel %vm560_vm0, %v556_v51, 0.0 }
  0x2a   : > { %v583_v60 = vsel %vm560_vm0, %v538_v50, 0.0  ;;  %v563_v61 = vadd.f32 %v562_v57, %v561_v53  ;;  %v566_v63 = vsel %vm560_vm0, %v557_v52, 0.0 }
  0x2b   : > { %v581_v59 = vsel %vm560_vm0, %v576_v54, 0.0  ;;  %v585_v0 = vsel %vm560_vm0, %v577_v55, 0.0 }
  0x2c   : > { %v582_v62 = vadd.f32 %v581_v59, %v580_v56  ;;  %v565_v1 = vadd.f32 %v564_v58, %v563_v61 }
  0x2e   : > { %v584_v2 = vadd.f32 %v583_v60, %v582_v62  ;;  %v567_v3 = vadd.f32 %v566_v63, %v565_v1 }
  0x30   : > { %v586_v4 = vadd.f32 %v585_v0, %v584_v2  ;;  %568 = vadd.xlane.f32.xlu0 %v567_v3 }
  0x32   : > { %587 = vadd.xlane.f32.xlu1 %v586_v4 }
  0xb5   : > { %v606_v5 = vpop.xlane.xlu0 %605 }
  0xb6   : > { %607 = vst.msk [vmem:[%s365_s7] sm:$0xf] %vm570_vm6, %v606_v5 }
  0xb7   : > { %905 = shalt.err (!%p902_p5)
}
  0xb8   : > { %s906_s17 = scalar_lea.hbm %s1092_s12, 64  ;;  %s910_s27 = scalar_lea.hbm %s1155_s5, 128 }
  0xb9   : > { %p907_p6 = scmp.ne.s32.totalorder %s1092_s12, %s906_s17  ;;  %p911_p10 = scmp.lt.u32.totalorder %s1092_s12, %s1155_s5 }
  0xba   : > { %p912_p11 = scmp.lt.u32.totalorder %s910_s27, %s906_s17  ;;  %p914_p13 = scmp.lt.u32.totalorder %s906_s17, %s1092_s12 }
  0xbb   : > { %p908_p7 = pnand %p907_p6, %p1044_p4 }
  0xbc   : > { %p913_p12 = por %p912_p11, %p911_p10 }
  0xbd   : > { %p909_p9 = pneg %p908_p7 }
  0xbe   : > { %p915_p0 = por %p914_p13, %p913_p12 }
  0xc0   : > { %p916_p1 = pnand %p915_p0, %p909_p9 }
  0xc2   : > { %919 = shalt.err (!%p916_p1)
}
  0xc3   : > { %836 = dma.vmem_to_hbm [thread:$0]  (%p1044_p4), %s1094_s9, 64, %s1092_s12, %s623_s13   ;;  %v569_v6 = vpop.xlane.xlu0 %568  ;;  %v588_v7 = vpop.xlane.xlu1 %587 }
  0xc4   : > { %s418_s14 = scalar_lea.vmem %s1153_s3, %s1061_s8  ;;  %s425_s16 = scalar_lea.vmem %s1154_s4, %s1061_s8 }
  0xc5   : > { %571 = vst.msk [vmem:[%s418_s14] sm:$0xf] %vm570_vm6, %v569_v6  ;;  %589 = vst.msk [vmem:[%s425_s16] sm:$0xf] %vm570_vm6, %v588_v7 }
  0xc6 PF: > { %p842_p2 = scmp.ge.s32.totalorder %s970_s23, 2  ;;  %s675_s28 = sand.u32 1, %s950_s18  }
  0xc7   : > { %s676_s9 = scalar_lea.sflag [#allocation6], %s675_s28 }
  0xc8   : > { %p839_p4 = pnand %p842_p2, %p1051_p8 }
  0xca   : > { %945 = dma.done.wait (!%p839_p4), %s676_s9, 64  }
  0xcb   : > { %947 = vsyncadd (!%p839_p4), %s676_s9, 4294967232  ;;  %s19_s23 = sadd.s32 1, %s970_s23   ;;  %s1158_s18 = smov %s954_s19 }
  0xcc   : > { %p16_p3 = scmp.ge.s32.totalorder %s19_s23, 4   ;;  %s1159_s19 = smov %s958_s20 }
  0xcd   : > { %s1160_s20 = smov %s1057_s6  ;;  %s1161_s21 = smov %s966_s22 }
  0xce   : > { %s1162_s22 = smov %s1164_s26  ;;  %18 = sbr.rel (!%p16_p3) target bundleno = 4 (0x4), region = 105 }
  0xd5   :  { %681 = vsyncpa [#allocation6], 1 }
  0xd6   :  { %683 = vsyncpa [#allocation6 + $0x1], 1 }

</bundles_post_ra>
